<compile_context>
chip_gen: v5e
topology: v5e:2x2
jax: 0.10.0
libtpu: 0.0.40
codegen_flags: <defaults>
</compile_context>

<pallas_src>
import jax
import jax.numpy as jnp
from jax.experimental import pallas as pl
from jax.experimental.pallas import tpu as pltpu


def _round_up(x, m):
    return (x + m - 1) // m * m


def _l1_partial_kernel(pred_ref, targ_ref, out_ref):
    # pred_ref / targ_ref: (Bt, Npad) f32, already mask-multiplied in the wrapper.
    bt, npad = pred_ref.shape

    # Fold Bt rows -> 8 sublanes in a single streaming pass over aligned (8, Npad)
    # slabs (no full-block temporaries, plain VPU adds; no XLU cross-lane work).
    acc = jnp.abs(pred_ref[0:8, :] - targ_ref[0:8, :])
    for g in range(1, bt // 8):                      # trace-time constant, small
        lo = g * 8
        acc = acc + jnp.abs(pred_ref[lo:lo + 8, :] - targ_ref[lo:lo + 8, :])

    # Fold the Npad lanes into one (8, 128) vreg-aligned block (aligned VPU adds).
    acc128 = acc[:, 0:128]
    for j in range(1, npad // 128):
        lo = j * 128
        acc128 = acc128 + acc[:, lo:lo + 128]

    out_ref[...] = acc128                            # tiny unmasked (8, 128) store


@jax.jit
def l1_loss(output, mask, ind, target):
    """output: (B, C, H, W), mask: (B, K), ind: (B, K) int, target: (B, K, C)."""
    B, C, H, W = output.shape
    _, K = ind.shape
    HW = H * W

    # --- Gather in the original NCHW layout (reads only ~B*C*K elements). ---
    feat = output.reshape(B, C, HW)                                   # view, no copy
    idx = jnp.broadcast_to(ind.astype(jnp.int32)[:, None, :], (B, C, K))
    pred = jnp.take_along_axis(feat, idx, axis=2)                     # (B, C, K)
    pred = jnp.transpose(pred, (0, 2, 1))                             # tiny (B, K, C)

    # --- Fold the mask multiply into the wrapper (fuses with the pad below). ---
    mask_e = mask.astype(jnp.float32)[:, :, None]                     # (B, K, 1)
    pred_m = pred.astype(jnp.float32) * mask_e                        # (B, K, C)
    targ_m = target.astype(jnp.float32) * mask_e                      # (B, K, C)

    # --- Flatten to lane-dense 2-D tiles: (B, K*C) zero-padded to (Bp, Npad). ---
    N = K * C
    Npad = _round_up(max(N, 128), 128)

    # Row-tile size: ~8 MiB of input per grid step (amortizes ~0.35us/step overhead),
    # multiple of 8 sublanes.
    bytes_per_row = 2 * Npad * 4                                      # two f32 inputs
    rows_budget = max(8, ((8 << 20) // bytes_per_row) // 8 * 8)
    Bt = min(_round_up(B, 8), rows_budget)
    if B > 8:
        # Guarantee >=2 balanced "parallel" grid steps so v7x's 2 TensorCores share work.
        Bt = min(Bt, _round_up(-(-B // 2), 8))
    Bp = _round_up(B, Bt)
    num_tiles = Bp // Bt

    def flat_pad(x):
        x = x.reshape(B, N)
        return jnp.pad(x, ((0, Bp - B), (0, Npad - N)))               # zeros contribute 0

    pred_f = flat_pad(pred_m)
    targ_f = flat_pad(targ_m)

    # Generation-safe VMEM budget: 2 inputs x 2 pipeline buffers + headroom,
    # floor 16 MiB (v5e scoped default), cap 48 MiB (v7x has 64 MiB physical).
    vmem_need = 2 * 2 * Bt * Npad * 4 + 2 * 8 * 128 * 4
    vmem_limit = int(min(48 << 20, max(16 << 20, 2 * vmem_need)))

    partials = pl.pallas_call(
        _l1_partial_kernel,
        out_shape=jax.ShapeDtypeStruct((num_tiles, 8, 128), jnp.float32),
        grid_spec=pltpu.PrefetchScalarGridSpec(
            num_scalar_prefetch=0,
            grid=(num_tiles,),
            in_specs=[
                pl.BlockSpec((Bt, Npad), lambda i: (i, 0)),           # pred * mask
                pl.BlockSpec((Bt, Npad), lambda i: (i, 0)),           # target * mask
            ],
            # Each grid step owns its own tiny output block -> no revisited accumulator,
            # batch axis runs fully parallel across TensorCores.
            out_specs=pl.BlockSpec((None, 8, 128), lambda i: (i, 0, 0)),
        ),
        compiler_params=pltpu.CompilerParams(
            dimension_semantics=("parallel",),
            vmem_limit_bytes=vmem_limit),
    )(pred_f, targ_f)

    inv_n = 1.0 / float(B * K * C)                   # mean over ALL B*K*C elements
    return jnp.sum(partials) * jnp.float32(inv_n)    # tiny final reduce in XLA


if __name__ == "__main__":
    key = jax.random.PRNGKey(0)
    k1, k2, k3, k4 = jax.random.split(key, 4)

    B, C, H, W, K = 2, 4, 16, 16, 8

    output = jax.random.normal(k1, (B, C, H, W), dtype=jnp.float32)
    ind = jax.random.randint(k2, (B, K), 0, H * W, dtype=jnp.int32)
    mask = (jax.random.uniform(k3, (B, K)) > 0.3).astype(jnp.float32)
    target = jax.random.normal(k4, (B, K, C), dtype=jnp.float32)

    loss = l1_loss(output, mask, ind, target)
    jax.block_until_ready(loss)

    # Pure-JAX reference of the original PyTorch semantics.
    feat_ref = jnp.transpose(output, (0, 2, 3, 1)).reshape(B, H * W, C)
    idx_ref = jnp.broadcast_to(ind[:, :, None].astype(jnp.int32), (B, K, C))
    pred_ref = jnp.take_along_axis(feat_ref, idx_ref, axis=1)
    m_ref = mask[:, :, None]
    loss_ref = jnp.mean(jnp.abs(pred_ref * m_ref - target * m_ref))
    assert jnp.allclose(loss, loss_ref, atol=1e-6, rtol=1e-5), (loss, loss_ref)

    print("KERNEL_OK")
</pallas_src>

<mosaic_0001>
module attributes {stable_mosaic.version = 11 : i64} {
  func.func @_l1_partial_kernel(%arg0: i32, %arg1: memref<8x128xf32, #tpu.memory_space<vmem>>, %arg2: memref<8x128xf32, #tpu.memory_space<vmem>>, %arg3: memref<1x8x128xf32, #tpu.memory_space<vmem>>) attributes {dimension_semantics = [#tpu.dimension_semantics<parallel>], iteration_bounds = array<i64: 1>, scalar_prefetch = 0 : i64, scratch_operands = 0 : i64, tpu.core_type = #tpu.core_type<tc>, window_params = [{transform_indices = @transform_0, window_bounds = array<i64: 8, 128>}, {transform_indices = @transform_1, window_bounds = array<i64: 8, 128>}, {transform_indices = @transform_2, window_bounds = array<i64: 1, 8, 128>}]} {
    %c0 = arith.constant 0 : index
    %c0_0 = arith.constant 0 : index
    %0 = vector.load %arg1[%c0, %c0_0] : memref<8x128xf32, #tpu.memory_space<vmem>>, vector<8x128xf32>
    %c0_1 = arith.constant 0 : index
    %c0_2 = arith.constant 0 : index
    %1 = vector.load %arg2[%c0_1, %c0_2] : memref<8x128xf32, #tpu.memory_space<vmem>>, vector<8x128xf32>
    %2 = arith.subf %0, %1 : vector<8x128xf32>
    %3 = math.absf %2 : vector<8x128xf32>
    %c0_3 = arith.constant 0 : index
    %c0_4 = arith.constant 0 : index
    %c0_5 = arith.constant 0 : index
    %4 = vector.load %arg3[%c0_3, %c0_4, %c0_5] : memref<1x8x128xf32, #tpu.memory_space<vmem>>, vector<1x8x128xf32>
    %5 = vector.shape_cast %4 : vector<1x8x128xf32> to vector<8x128xf32>
    %6 = vector.shape_cast %3 : vector<8x128xf32> to vector<1x8x128xf32>
    tpu.vector_store %arg3[%c0_3, %c0_4, %c0_5], %6 {strides = array<i32>} : memref<1x8x128xf32, #tpu.memory_space<vmem>>, vector<1x8x128xf32>,
    return
  }
  func.func @transform_0(%arg0: i32) -> (i32, i32) {
    %c0_i32 = arith.constant 0 : i32
    %c0_i32_0 = arith.constant 0 : i32
    return %arg0, %c0_i32 : i32, i32
  }
  func.func @transform_1(%arg0: i32) -> (i32, i32) {
    %c0_i32 = arith.constant 0 : i32
    %c0_i32_0 = arith.constant 0 : i32
    return %arg0, %c0_i32 : i32, i32
  }
  func.func @transform_2(%arg0: i32) -> (i32, i32, i32) {
    %c0_i32 = arith.constant 0 : i32
    %c0_i32_0 = arith.constant 0 : i32
    %c0_i32_1 = arith.constant 0 : i32
    return %arg0, %c0_i32, %c0_i32_0 : i32, i32, i32
  }
}

</mosaic_0001>

<bundles_post_ra>
// kernel: l1_loss.1
= control target key start
LH: loop header
LB: loop body
LE: loop exit
PB: predicated region body
PF: predicated region fallthrough
CT: control target
= control target key end

     0   :  { %s44_s0 = inlined_call_operand.vmem [shape: f32[8,128], index: 0, kind: input, shape index: {}]   ;;  %s45_s1 = inlined_call_operand.vmem [shape: f32[8,128], index: 1, kind: input, shape index: {}]   ;;  %s46_s2 = inlined_call_operand.vmem [shape: f32[1,8,128], index: 2, kind: output, shape index: {}]  }
   0x1   :  { %v11_v0 = vld [vmem:[%s44_s0] sm:$0xff] }
   0x2   :  { %v12_v1 = vld [vmem:[%s45_s1] sm:$0xff] }
   0x3   :  { %v13_v2 = vsub.f32 %v11_v0, %v12_v1 }
   0x5   :  { %v14_v3 = vand.u32 2147483647, %v13_v2 }
   0x7   :  { %15 = vst [vmem:[%s46_s2] sm:$0xff] %v14_v3 }

</bundles_post_ra>
